<compile_context>
chip_gen: v7x
topology: tpu7x:2x2x1
jax: 0.10.0
libtpu: 0.0.40
codegen_flags: <defaults>
</compile_context>

<pallas_src>
import functools

import jax
import jax.numpy as jnp
from jax import lax
from jax.experimental import pallas as pl
from jax.experimental.pallas import tpu as pltpu


def dalr_kernel(idf_ref, agef_ref, genf_ref, wid_ref, wage_ref, wgen_ref,
                out_ref, pid_scr, page_scr, pgen_scr, *, batch):
    i = pl.program_id(0)
    tb = idf_ref.shape[0]

    # --- streaming phase: project this batch tile on the VPU -----------------
    # nn.Linear(D, 1, bias=False): broadcast-mul against the resident (1, D)
    # weight row + lane reduce.  No MXU push/pop, no weight relayout.
    p_id = jnp.sum(idf_ref[...] * wid_ref[...], axis=-1, keepdims=True)    # (tb, 1)
    p_age = jnp.sum(agef_ref[...] * wage_ref[...], axis=-1, keepdims=True)
    p_gen = jnp.sum(genf_ref[...] * wgen_ref[...], axis=-1, keepdims=True)

    off = pl.multiple_of(i * tb, tb)
    pid_scr[pl.ds(off, tb), :] = p_id
    page_scr[pl.ds(off, tb), :] = p_age
    pgen_scr[pl.ds(off, tb), :] = p_gen

    # --- epilogue on the last tile: exact centered statistics ----------------
    @pl.when(i == pl.num_programs(0) - 1)
    def _():
        padded = pid_scr.shape[0]
        pid, page, pgen = pid_scr[...], page_scr[...], pgen_scr[...]

        if padded != batch:  # static branch: only emitted for a ragged last tile
            rows = lax.broadcasted_iota(jnp.int32, (padded, 1), 0)
            valid = rows < batch
            mask = lambda x: jnp.where(valid, x, 0.0)
        else:
            mask = lambda x: x

        inv_b = jnp.float32(1.0 / batch)
        m_id = jnp.sum(mask(pid), axis=0, keepdims=True) * inv_b            # (1, 1)
        m_age = jnp.sum(mask(page), axis=0, keepdims=True) * inv_b
        m_gen = jnp.sum(mask(pgen), axis=0, keepdims=True) * inv_b

        c_id = mask(pid - m_id)                                              # (padded, 1)
        c_age = mask(page - m_age)
        c_gen = mask(pgen - m_gen)

        # torch.var(dim=0) is unbiased (divides by B - 1), then + 1e-6.
        inv_bm1 = jnp.float32(1.0 / (batch - 1))
        v_id = jnp.sum(c_id * c_id, axis=0, keepdims=True) * inv_bm1 + 1e-6
        v_age = jnp.sum(c_age * c_age, axis=0, keepdims=True) * inv_bm1 + 1e-6
        v_gen = jnp.sum(c_gen * c_gen, axis=0, keepdims=True) * inv_bm1 + 1e-6

        # covariances use .mean(dim=0) -> divide by B.
        cov_ia = jnp.sum(c_age * c_id, axis=0, keepdims=True) * inv_b
        cov_ig = jnp.sum(c_gen * c_id, axis=0, keepdims=True) * inv_b
        cov_ag = jnp.sum(c_age * c_gen, axis=0, keepdims=True) * inv_b

        corr = (cov_ia * cov_ia / (v_age * v_id)
                + cov_ig * cov_ig / (v_gen * v_id)
                + cov_ag * cov_ag / (v_age * v_gen)) * jnp.float32(1.0 / 3.0)
        out_ref[...] = corr


def _vmem_padded_bytes(rows, cols, itemsize=4):
    # VMEM allocations are tiled to (8, 128) 32-bit words.
    return ((rows + 7) // 8) * 8 * ((cols + 127) // 128) * 128 * itemsize


def dalr_forward(id_features, age_features, gender_features,
                 w_id, w_age, w_gen, *, tile_b=None):
    """Returns a tensor of shape (1,) matching the PyTorch module's output shape."""
    B, D = id_features.shape
    itemsize = 4  # float32

    if tile_b is None:
        # Largest batch tile whose three double-buffered (tile_b, D) feature
        # tiles stay inside a ~16 MiB streaming budget (valid from v5e's scoped
        # default up through v7x's 64 MiB physical VMEM).
        budget = 16 << 20
        tile_b = budget // (3 * 2 * D * itemsize)
    tile_b = max(1, min(int(tile_b), B))
    if tile_b < B:
        tile_b = max(8, (tile_b // 8) * 8)  # sublane-aligned batch tiles

    nt = pl.cdiv(B, tile_b)
    padded_b = nt * tile_b

    feat_spec = pl.BlockSpec((tile_b, D), lambda i: (i, 0))
    w_spec = pl.BlockSpec((1, D), lambda i: (0, 0))  # constant index -> fetched once

    vmem_limit = (3 * 2 * _vmem_padded_bytes(tile_b, D)   # double-buffered feature tiles
                  + 3 * 2 * _vmem_padded_bytes(1, D)      # resident weight rows
                  + 3 * _vmem_padded_bytes(padded_b, 1)   # projection scratch
                  + (2 << 20))                            # headroom
    vmem_limit = int(min(max(vmem_limit, 16 << 20), 48 << 20))

    out = pl.pallas_call(
        functools.partial(dalr_kernel, batch=B),
        out_shape=jax.ShapeDtypeStruct((1, 1), jnp.float32),
        grid=(nt,),
        in_specs=[feat_spec, feat_spec, feat_spec, w_spec, w_spec, w_spec],
        out_specs=pl.BlockSpec((1, 1), lambda i: (0, 0)),
        scratch_shapes=[pltpu.VMEM((padded_b, 1), jnp.float32)] * 3,
        cost_estimate=pl.CostEstimate(
            flops=6 * B * D + 40 * B,                      # 3 projections + epilogue
            transcendentals=0,
            bytes_accessed=(3 * B * D + 3 * D + 1) * itemsize,
        ),
        compiler_params=pltpu.CompilerParams(
            dimension_semantics=("arbitrary",),            # sequential reduction over B
            vmem_limit_bytes=vmem_limit,
        ),
    )(id_features, age_features, gender_features, w_id, w_age, w_gen)
    return out.reshape((1,))


if __name__ == "__main__":
    def ref(idf, agef, genf, wi, wa, wg):
        b = idf.shape[0]
        ip, ap, gp = idf @ wi.T, agef @ wa.T, genf @ wg.T
        im, am, gm = ip.mean(0), ap.mean(0), gp.mean(0)
        iv = ((ip - im) ** 2).sum(0) / (b - 1) + 1e-6
        av = ((ap - am) ** 2).sum(0) / (b - 1) + 1e-6
        gv = ((gp - gm) ** 2).sum(0) / (b - 1) + 1e-6
        ia = (((ap - am) * (ip - im)).mean(0)) ** 2 / (av * iv)
        ig = (((gp - gm) * (ip - im)).mean(0)) ** 2 / (gv * iv)
        ag = (((ap - am) * (gp - gm)).mean(0)) ** 2 / (av * gv)
        return (ia + ig + ag) / 3.0

    def make_inputs(key, b, d):
        k1, k2, k3, k4, k5, k6 = jax.random.split(key, 6)
        bound = 1.0 / float(d) ** 0.5  # Kaiming-uniform-like bound for nn.Linear
        return (jax.random.normal(k1, (b, d), jnp.float32),
                jax.random.normal(k2, (b, d), jnp.float32),
                jax.random.normal(k3, (b, d), jnp.float32),
                jax.random.uniform(k4, (1, d), jnp.float32, -bound, bound),
                jax.random.uniform(k5, (1, d), jnp.float32, -bound, bound),
                jax.random.uniform(k6, (1, d), jnp.float32, -bound, bound))

    key = jax.random.PRNGKey(0)
    k_small, k_big = jax.random.split(key)

    # Primary small case (batch=8, input_dimension=32), single grid step.
    args = make_inputs(k_small, 8, 32)
    loss = dalr_forward(*args)
    jax.block_until_ready(loss)
    assert loss.shape == (1,)
    assert jnp.allclose(loss, ref(*args), rtol=1e-4, atol=1e-6)

    # Multi-tile case with a ragged last tile (exercises the streaming grid,
    # the projection scratch and the row mask): B=200, D=128, tile_b=64.
    args2 = make_inputs(k_big, 200, 128)
    loss2 = dalr_forward(*args2, tile_b=64)
    jax.block_until_ready(loss2)
    assert loss2.shape == (1,)
    assert jnp.allclose(loss2, ref(*args2), rtol=1e-4, atol=1e-6)

    print("KERNEL_OK")
</pallas_src>

<mosaic_0001>
module attributes {stable_mosaic.version = 11 : i64} {
  func.func @dalr_kernel(%arg0: i32, %arg1: memref<8x32xf32, #tpu.memory_space<vmem>>, %arg2: memref<8x32xf32, #tpu.memory_space<vmem>>, %arg3: memref<8x32xf32, #tpu.memory_space<vmem>>, %arg4: memref<1x32xf32, #tpu.memory_space<vmem>>, %arg5: memref<1x32xf32, #tpu.memory_space<vmem>>, %arg6: memref<1x32xf32, #tpu.memory_space<vmem>>, %arg7: memref<1x1xf32, #tpu.memory_space<vmem>>, %arg8: memref<8x1xf32, #tpu.memory_space<vmem>>, %arg9: memref<8x1xf32, #tpu.memory_space<vmem>>, %arg10: memref<8x1xf32, #tpu.memory_space<vmem>>) attributes {dimension_semantics = [#tpu.dimension_semantics<arbitrary>], iteration_bounds = array<i64: 1>, scalar_prefetch = 0 : i64, scratch_operands = 3 : i64, tpu.core_type = #tpu.core_type<tc>, window_params = [{transform_indices = @transform_0, window_bounds = array<i64: 8, 32>}, {transform_indices = @transform_1, window_bounds = array<i64: 8, 32>}, {transform_indices = @transform_2, window_bounds = array<i64: 8, 32>}, {pipeline_mode = #tpu.pipeline_mode<synchronous>, transform_indices = @transform_3, window_bounds = array<i64: 1, 32>}, {pipeline_mode = #tpu.pipeline_mode<synchronous>, transform_indices = @transform_4, window_bounds = array<i64: 1, 32>}, {pipeline_mode = #tpu.pipeline_mode<synchronous>, transform_indices = @transform_5, window_bounds = array<i64: 1, 32>}, {pipeline_mode = #tpu.pipeline_mode<synchronous>, transform_indices = @transform_6, window_bounds = array<i64: 1, 1>}]} {
    %c0 = arith.constant 0 : index
    %c0_0 = arith.constant 0 : index
    %0 = vector.load %arg1[%c0, %c0_0] : memref<8x32xf32, #tpu.memory_space<vmem>>, vector<8x32xf32>
    %c0_1 = arith.constant 0 : index
    %c0_2 = arith.constant 0 : index
    %1 = vector.load %arg4[%c0_1, %c0_2] : memref<1x32xf32, #tpu.memory_space<vmem>>, vector<1x32xf32>
    %2 = vector.broadcast %1 : vector<1x32xf32> to vector<8x32xf32>
    %3 = arith.mulf %0, %2 : vector<8x32xf32>
    %cst = arith.constant dense<0.000000e+00> : vector<8xf32>
    %4 = vector.multi_reduction <add>, %3, %cst [1] : vector<8x32xf32> to vector<8xf32>
    %5 = vector.shape_cast %4 : vector<8xf32> to vector<8x1xf32>
    %c0_3 = arith.constant 0 : index
    %c0_4 = arith.constant 0 : index
    %6 = vector.load %arg2[%c0_3, %c0_4] : memref<8x32xf32, #tpu.memory_space<vmem>>, vector<8x32xf32>
    %c0_5 = arith.constant 0 : index
    %c0_6 = arith.constant 0 : index
    %7 = vector.load %arg5[%c0_5, %c0_6] : memref<1x32xf32, #tpu.memory_space<vmem>>, vector<1x32xf32>
    %8 = vector.broadcast %7 : vector<1x32xf32> to vector<8x32xf32>
    %9 = arith.mulf %6, %8 : vector<8x32xf32>
    %cst_7 = arith.constant dense<0.000000e+00> : vector<8xf32>
    %10 = vector.multi_reduction <add>, %9, %cst_7 [1] : vector<8x32xf32> to vector<8xf32>
    %11 = vector.shape_cast %10 : vector<8xf32> to vector<8x1xf32>
    %c0_8 = arith.constant 0 : index
    %c0_9 = arith.constant 0 : index
    %12 = vector.load %arg3[%c0_8, %c0_9] : memref<8x32xf32, #tpu.memory_space<vmem>>, vector<8x32xf32>
    %c0_10 = arith.constant 0 : index
    %c0_11 = arith.constant 0 : index
    %13 = vector.load %arg6[%c0_10, %c0_11] : memref<1x32xf32, #tpu.memory_space<vmem>>, vector<1x32xf32>
    %14 = vector.broadcast %13 : vector<1x32xf32> to vector<8x32xf32>
    %15 = arith.mulf %12, %14 : vector<8x32xf32>
    %cst_12 = arith.constant dense<0.000000e+00> : vector<8xf32>
    %16 = vector.multi_reduction <add>, %15, %cst_12 [1] : vector<8x32xf32> to vector<8xf32>
    %17 = vector.shape_cast %16 : vector<8xf32> to vector<8x1xf32>
    %c8_i32 = arith.constant 8 : i32
    %18 = arith.muli %arg0, %c8_i32 : i32
    %19 = tpu.assume_multiple %18, 8 : i32
    %20 = arith.index_cast %19 : i32 to index
    %c0_13 = arith.constant 0 : index
    %21 = vector.load %arg8[%20, %c0_13] : memref<8x1xf32, #tpu.memory_space<vmem>>, vector<8x1xf32>
    tpu.vector_store %arg8[%20, %c0_13], %5 {strides = array<i32>} : memref<8x1xf32, #tpu.memory_space<vmem>>, vector<8x1xf32>,
    %22 = arith.index_cast %19 : i32 to index
    %c0_14 = arith.constant 0 : index
    %23 = vector.load %arg9[%22, %c0_14] : memref<8x1xf32, #tpu.memory_space<vmem>>, vector<8x1xf32>
    tpu.vector_store %arg9[%22, %c0_14], %11 {strides = array<i32>} : memref<8x1xf32, #tpu.memory_space<vmem>>, vector<8x1xf32>,
    %24 = arith.index_cast %19 : i32 to index
    %c0_15 = arith.constant 0 : index
    %25 = vector.load %arg10[%24, %c0_15] : memref<8x1xf32, #tpu.memory_space<vmem>>, vector<8x1xf32>
    tpu.vector_store %arg10[%24, %c0_15], %17 {strides = array<i32>} : memref<8x1xf32, #tpu.memory_space<vmem>>, vector<8x1xf32>,
    %c0_i32 = arith.constant 0 : i32
    %26 = arith.cmpi eq, %arg0, %c0_i32 : i32
    %27 = arith.extui %26 : i1 to i32
    %c0_i32_16 = arith.constant 0 : i32
    %28 = arith.cmpi ne, %27, %c0_i32_16 : i32
    scf.if %28 {
      %c0_17 = arith.constant 0 : index
      %c0_18 = arith.constant 0 : index
      %29 = vector.load %arg8[%c0_17, %c0_18] : memref<8x1xf32, #tpu.memory_space<vmem>>, vector<8x1xf32>
      %c0_19 = arith.constant 0 : index
      %c0_20 = arith.constant 0 : index
      %30 = vector.load %arg9[%c0_19, %c0_20] : memref<8x1xf32, #tpu.memory_space<vmem>>, vector<8x1xf32>
      %c0_21 = arith.constant 0 : index
      %c0_22 = arith.constant 0 : index
      %31 = vector.load %arg10[%c0_21, %c0_22] : memref<8x1xf32, #tpu.memory_space<vmem>>, vector<8x1xf32>
      %cst_23 = arith.constant dense<0.000000e+00> : vector<1xf32>
      %32 = vector.multi_reduction <add>, %29, %cst_23 [0] : vector<8x1xf32> to vector<1xf32>
      %33 = vector.shape_cast %32 : vector<1xf32> to vector<1x1xf32>
      %cst_24 = arith.constant 1.250000e-01 : f32
      %34 = vector.broadcast %cst_24 : f32 to vector<1x1xf32>
      %35 = arith.mulf %33, %34 : vector<1x1xf32>
      %cst_25 = arith.constant dense<0.000000e+00> : vector<1xf32>
      %36 = vector.multi_reduction <add>, %30, %cst_25 [0] : vector<8x1xf32> to vector<1xf32>
      %37 = vector.shape_cast %36 : vector<1xf32> to vector<1x1xf32>
      %cst_26 = arith.constant 1.250000e-01 : f32
      %38 = vector.broadcast %cst_26 : f32 to vector<1x1xf32>
      %39 = arith.mulf %37, %38 : vector<1x1xf32>
      %cst_27 = arith.constant dense<0.000000e+00> : vector<1xf32>
      %40 = vector.multi_reduction <add>, %31, %cst_27 [0] : vector<8x1xf32> to vector<1xf32>
      %41 = vector.shape_cast %40 : vector<1xf32> to vector<1x1xf32>
      %cst_28 = arith.constant 1.250000e-01 : f32
      %42 = vector.broadcast %cst_28 : f32 to vector<1x1xf32>
      %43 = arith.mulf %41, %42 : vector<1x1xf32>
      %44 = vector.broadcast %35 : vector<1x1xf32> to vector<8x1xf32>
      %45 = arith.subf %29, %44 : vector<8x1xf32>
      %46 = vector.broadcast %39 : vector<1x1xf32> to vector<8x1xf32>
      %47 = arith.subf %30, %46 : vector<8x1xf32>
      %48 = vector.broadcast %43 : vector<1x1xf32> to vector<8x1xf32>
      %49 = arith.subf %31, %48 : vector<8x1xf32>
      %50 = arith.mulf %45, %45 : vector<8x1xf32>
      %cst_29 = arith.constant dense<0.000000e+00> : vector<1xf32>
      %51 = vector.multi_reduction <add>, %50, %cst_29 [0] : vector<8x1xf32> to vector<1xf32>
      %52 = vector.shape_cast %51 : vector<1xf32> to vector<1x1xf32>
      %cst_30 = arith.constant 0.142857149 : f32
      %53 = vector.broadcast %cst_30 : f32 to vector<1x1xf32>
      %54 = arith.mulf %52, %53 : vector<1x1xf32>
      %cst_31 = arith.constant 9.99999997E-7 : f32
      %55 = vector.broadcast %cst_31 : f32 to vector<1x1xf32>
      %56 = arith.addf %54, %55 : vector<1x1xf32>
      %57 = arith.mulf %47, %47 : vector<8x1xf32>
      %cst_32 = arith.constant dense<0.000000e+00> : vector<1xf32>
      %58 = vector.multi_reduction <add>, %57, %cst_32 [0] : vector<8x1xf32> to vector<1xf32>
      %59 = vector.shape_cast %58 : vector<1xf32> to vector<1x1xf32>
      %cst_33 = arith.constant 0.142857149 : f32
      %60 = vector.broadcast %cst_33 : f32 to vector<1x1xf32>
      %61 = arith.mulf %59, %60 : vector<1x1xf32>
      %cst_34 = arith.constant 9.99999997E-7 : f32
      %62 = vector.broadcast %cst_34 : f32 to vector<1x1xf32>
      %63 = arith.addf %61, %62 : vector<1x1xf32>
      %64 = arith.mulf %49, %49 : vector<8x1xf32>
      %cst_35 = arith.constant dense<0.000000e+00> : vector<1xf32>
      %65 = vector.multi_reduction <add>, %64, %cst_35 [0] : vector<8x1xf32> to vector<1xf32>
      %66 = vector.shape_cast %65 : vector<1xf32> to vector<1x1xf32>
      %cst_36 = arith.constant 0.142857149 : f32
      %67 = vector.broadcast %cst_36 : f32 to vector<1x1xf32>
      %68 = arith.mulf %66, %67 : vector<1x1xf32>
      %cst_37 = arith.constant 9.99999997E-7 : f32
      %69 = vector.broadcast %cst_37 : f32 to vector<1x1xf32>
      %70 = arith.addf %68, %69 : vector<1x1xf32>
      %71 = arith.mulf %47, %45 : vector<8x1xf32>
      %cst_38 = arith.constant dense<0.000000e+00> : vector<1xf32>
      %72 = vector.multi_reduction <add>, %71, %cst_38 [0] : vector<8x1xf32> to vector<1xf32>
      %73 = vector.shape_cast %72 : vector<1xf32> to vector<1x1xf32>
      %cst_39 = arith.constant 1.250000e-01 : f32
      %74 = vector.broadcast %cst_39 : f32 to vector<1x1xf32>
      %75 = arith.mulf %73, %74 : vector<1x1xf32>
      %76 = arith.mulf %49, %45 : vector<8x1xf32>
      %cst_40 = arith.constant dense<0.000000e+00> : vector<1xf32>
      %77 = vector.multi_reduction <add>, %76, %cst_40 [0] : vector<8x1xf32> to vector<1xf32>
      %78 = vector.shape_cast %77 : vector<1xf32> to vector<1x1xf32>
      %cst_41 = arith.constant 1.250000e-01 : f32
      %79 = vector.broadcast %cst_41 : f32 to vector<1x1xf32>
      %80 = arith.mulf %78, %79 : vector<1x1xf32>
      %81 = arith.mulf %47, %49 : vector<8x1xf32>
      %cst_42 = arith.constant dense<0.000000e+00> : vector<1xf32>
      %82 = vector.multi_reduction <add>, %81, %cst_42 [0] : vector<8x1xf32> to vector<1xf32>
      %83 = vector.shape_cast %82 : vector<1xf32> to vector<1x1xf32>
      %cst_43 = arith.constant 1.250000e-01 : f32
      %84 = vector.broadcast %cst_43 : f32 to vector<1x1xf32>
      %85 = arith.mulf %83, %84 : vector<1x1xf32>
      %86 = arith.mulf %75, %75 : vector<1x1xf32>
      %87 = arith.mulf %63, %56 : vector<1x1xf32>
      %88 = arith.divf %86, %87 : vector<1x1xf32>
      %89 = arith.mulf %80, %80 : vector<1x1xf32>
      %90 = arith.mulf %70, %56 : vector<1x1xf32>
      %91 = arith.divf %89, %90 : vector<1x1xf32>
      %92 = arith.addf %88, %91 : vector<1x1xf32>
      %93 = arith.mulf %85, %85 : vector<1x1xf32>
      %94 = arith.mulf %63, %70 : vector<1x1xf32>
      %95 = arith.divf %93, %94 : vector<1x1xf32>
      %96 = arith.addf %92, %95 : vector<1x1xf32>
      %cst_44 = arith.constant 0.333333343 : f32
      %97 = vector.broadcast %cst_44 : f32 to vector<1x1xf32>
      %98 = arith.mulf %96, %97 : vector<1x1xf32>
      %c0_45 = arith.constant 0 : index
      %c0_46 = arith.constant 0 : index
      %99 = vector.load %arg7[%c0_45, %c0_46] : memref<1x1xf32, #tpu.memory_space<vmem>>, vector<1x1xf32>
      tpu.vector_store %arg7[%c0_45, %c0_46], %98 {strides = array<i32>} : memref<1x1xf32, #tpu.memory_space<vmem>>, vector<1x1xf32>,
    } else {
    }
    return
  }
  func.func @transform_0(%arg0: i32) -> (i32, i32) {
    %c0_i32 = arith.constant 0 : i32
    %c0_i32_0 = arith.constant 0 : i32
    return %arg0, %c0_i32 : i32, i32
  }
  func.func @transform_1(%arg0: i32) -> (i32, i32) {
    %c0_i32 = arith.constant 0 : i32
    %c0_i32_0 = arith.constant 0 : i32
    return %arg0, %c0_i32 : i32, i32
  }
  func.func @transform_2(%arg0: i32) -> (i32, i32) {
    %c0_i32 = arith.constant 0 : i32
    %c0_i32_0 = arith.constant 0 : i32
    return %arg0, %c0_i32 : i32, i32
  }
  func.func @transform_3(%arg0: i32) -> (i32, i32) {
    %c0_i32 = arith.constant 0 : i32
    %c0_i32_0 = arith.constant 0 : i32
    %c0_i32_1 = arith.constant 0 : i32
    return %c0_i32, %c0_i32_0 : i32, i32
  }
  func.func @transform_4(%arg0: i32) -> (i32, i32) {
    %c0_i32 = arith.constant 0 : i32
    %c0_i32_0 = arith.constant 0 : i32
    %c0_i32_1 = arith.constant 0 : i32
    return %c0_i32, %c0_i32_0 : i32, i32
  }
  func.func @transform_5(%arg0: i32) -> (i32, i32) {
    %c0_i32 = arith.constant 0 : i32
    %c0_i32_0 = arith.constant 0 : i32
    %c0_i32_1 = arith.constant 0 : i32
    return %c0_i32, %c0_i32_0 : i32, i32
  }
  func.func @transform_6(%arg0: i32) -> (i32, i32) {
    %c0_i32 = arith.constant 0 : i32
    %c0_i32_0 = arith.constant 0 : i32
    %c0_i32_1 = arith.constant 0 : i32
    return %c0_i32, %c0_i32_0 : i32, i32
  }
}

</mosaic_0001>

<bundles_post_ra>
// kernel: tpu_custom_call.1
= control target key start
LH: loop header
LB: loop body
LE: loop exit
PB: predicated region body
PF: predicated region fallthrough
CT: control target
= control target key end

     0   :  { %11 = vsyncpa [#allocation6], 0  ;;  %s443_s0 = inlined_call_operand.hbm [shape: f32[8,32], index: 0, kind: input, shape index: {}]   ;;  %s444_s1 = inlined_call_operand.hbm [shape: f32[8,32], index: 1, kind: input, shape index: {}]   ;;  %s445_s2 = inlined_call_operand.hbm [shape: f32[8,32], index: 2, kind: input, shape index: {}]   ;;  %s446_s3 = inlined_call_operand.vmem [shape: f32[1,32], index: 3, kind: input, shape index: {}]   ;;  %s447_s4 = inlined_call_operand.vmem [shape: f32[1,32], index: 4, kind: input, shape index: {}]   ;;  %s448_s5 = inlined_call_operand.vmem [shape: f32[1,32], index: 5, kind: input, shape index: {}]   ;;  %s449_s6 = inlined_call_operand.hbm [shape: f32[1,1], index: 6, kind: output, shape index: {}]  }
   0x1   :  { %12 = vsyncpa [#allocation9], 0 }
   0x2   :  { %13 = vsyncpa [#allocation7], 0  ;;  %s335_s21 = smov [#allocation8]   ;;  %s336_s23 = smov [#allocation5]  }
   0x3   :  { %s30_s22 = sshll.u32 %s335_s21, 4  ;;  %s20_s24 = sshll.u32 %s336_s23, 4  ;;  %s31_s22 = int_to_ptr.vmem [resolvable:$true] %s30_s22  ;;  %s21_s24 = int_to_ptr.vmem [resolvable:$true] %s20_s24 }
   0x4   :  { %s241_s27 = scalar_lea.hbm %s444_s1, 128 }
   0x5   :  { %p242_p0 = scmp.ne.s32.totalorder %s444_s1, %s241_s27  ;;  %p245_p1 = scmp.lt.u32.totalorder %s241_s27, %s444_s1 }
   0x7   :  { %p247_p2 = pnand %p245_p1, %p242_p0 }
   0x9   :  { %250 = shalt.err (!%p247_p2)
}
   0xa   :  { %s251_s8 = scalar_lea.vmem %s31_s22, 128  ;;  %p256_p4 = scmp.lt.s32.totalorder %s31_s22, %s31_s22 }
   0xb   :  { %p252_p3 = scmp.ne.s32.totalorder %s31_s22, %s251_s8  ;;  %p257_p5 = scmp.lt.s32.totalorder %s251_s8, %s251_s8 }
   0xd   :  { %p258_p6 = por %p257_p5, %p256_p4 }
   0xf   :  { %p259_p7 = pnand %p258_p6, %p252_p3 }
  0x11   :  { %262 = shalt.err (!%p259_p7)
}
  0x12   :  { %33 = dma.hbm_to_vmem [thread:$0]  %s444_s1, 128, %s31_s22, [#allocation9]  }
  0x13   :  { %s263_s13 = scalar_lea.hbm %s443_s0, 128 }
  0x14   :  { %p264_p8 = scmp.ne.s32.totalorder %s443_s0, %s263_s13  ;;  %p267_p9 = scmp.lt.u32.totalorder %s263_s13, %s443_s0 }
  0x16   :  { %p269_p10 = pnand %p267_p9, %p264_p8 }
  0x18   :  { %272 = shalt.err (!%p269_p10)
}
  0x19   :  { %s273_s18 = scalar_lea.vmem %s21_s24, 128  ;;  %p278_p12 = scmp.lt.s32.totalorder %s21_s24, %s21_s24 }
  0x1a   :  { %p274_p11 = scmp.ne.s32.totalorder %s21_s24, %s273_s18  ;;  %p279_p13 = scmp.lt.s32.totalorder %s273_s18, %s273_s18 }
  0x1c   :  { %p280_p0 = por %p279_p13, %p278_p12 }
  0x1e   :  { %p281_p1 = pnand %p280_p0, %p274_p11 }
  0x20   :  { %284 = shalt.err (!%p281_p1)
}
  0x21   :  { %23 = dma.hbm_to_vmem [thread:$0]  %s443_s0, 128, %s21_s24, [#allocation6]  }
  0x22   :  { %s337_s20 = smov [#allocation10]   ;;  %s285_s25 = scalar_lea.hbm %s445_s2, 128 }
  0x23   :  { %s40_s21 = sshll.u32 %s337_s20, 4  ;;  %p286_p2 = scmp.ne.s32.totalorder %s445_s2, %s285_s25  ;;  %s41_s21 = int_to_ptr.vmem [resolvable:$true] %s40_s21 }
  0x24   :  { %p289_p3 = scmp.lt.u32.totalorder %s285_s25, %s445_s2 }
  0x26   :  { %p291_p4 = pnand %p289_p3, %p286_p2 }
  0x28   :  { %294 = shalt.err (!%p291_p4)
}
  0x29   :  { %s295_s30 = scalar_lea.vmem %s41_s21, 128  ;;  %p300_p6 = scmp.lt.s32.totalorder %s41_s21, %s41_s21 }
  0x2a   :  { %p296_p5 = scmp.ne.s32.totalorder %s41_s21, %s295_s30  ;;  %p301_p7 = scmp.lt.s32.totalorder %s295_s30, %s295_s30 }
  0x2c   :  { %p302_p8 = por %p301_p7, %p300_p6 }
  0x2e   :  { %p303_p9 = pnand %p302_p8, %p296_p5 }
  0x30   :  { %306 = shalt.err (!%p303_p9)
}
  0x31   :  { %43 = dma.hbm_to_vmem [thread:$0]  %s445_s2, 128, %s41_s21, [#allocation9]  }
  0x32   :  { %329 = dma.done.wait [#allocation6], 128  }
  0x33   :  { %330 = vsyncadd [#allocation6], 4294967168 }
  0x34   :  { %331 = dma.done.wait [#allocation9], 256  }
  0x35   :  { %332 = vsyncadd [#allocation9], 4294967040  ;;  %vm68_vm0 = vcmask 261120   ;;  %v84_v0 = vld [vmem:[#allocation10] sm:$0xff]  ;;  %v230_v1 = vld [vmem:[%s448_s5] ss:$0 sm:$0xff] }
  0x36   :  { %v59_v2 = vld [vmem:[#allocation5] sm:$0xff]  ;;  %v92_v3 = vmul.f32 %v230_v1, %v84_v0  ;;  %v228_v4 = vld [vmem:[%s446_s3] ss:$0 sm:$0xff]  ;;  %vm98_vm1 = vcmask 7168   ;;  %s338_s2 = smov [#allocation11]   ;;  %vm210_vm2 = vcmask 0  }
  0x37   :  { %v72_v5 = vld [vmem:[#allocation8] sm:$0xff]  ;;  %v67_v7 = vmul.f32 %v228_v4, %v59_v2  ;;  %s218_s3 = sshll.u32 %s338_s2, 4  ;;  %s219_s3 = int_to_ptr.vmem [resolvable:$true] %s218_s3 }
  0x38   :  { %v229_v6 = vld [vmem:[%s447_s4] ss:$0 sm:$0xff]  ;;  %v93_v9 = vsel %vm68_vm0, %v92_v3, 0.0  ;;  %s307_s4 = scalar_lea.vmem %s219_s3, 16  ;;  %s311_s5 = scalar_lea.vmem %s219_s3, 32 }
  0x39   :  { %v80_v8 = vmul.f32 %v229_v6, %v72_v5  ;;  %94 = vadd.xlane.f32.xlu1 %v93_v9  ;;  %v69_v10 = vsel %vm68_vm0, %v67_v7, 0.0  ;;  %p308_p10 = scmp.ne.s32.totalorder %s219_s3, %s307_s4  ;;  %p312_p11 = scmp.lt.s32.totalorder %s219_s3, %s219_s3 }
  0x3a   :  { %70 = vadd.xlane.f32.xlu0 %v69_v10  ;;  %p313_p12 = scmp.lt.s32.totalorder %s311_s5, %s307_s4 }
  0x3b   :  { %v81_v11 = vsel %vm68_vm0, %v80_v8, 0.0 }
  0x3c   :  { %p314_p13 = por %p313_p12, %p312_p11 }
  0x3e   :  { %82 = vadd.xlane.f32.xlu0 %v81_v11  ;;  %p315_p0 = pnand %p314_p13, %p308_p10 }
  0xc6   :  { %v95_v12 = vpop.xlane.xlu1 %94 }
  0xc7   :  { %103 = vst.msk [vmem:[#allocation4] sm:$0xff] %vm98_vm1, %v95_v12  ;;  %v71_v13 = vpop.xlane.xlu0 %70 }
  0xc8   :  { %99 = vst.msk [vmem:[#allocation2] sm:$0xff] %vm98_vm1, %v71_v13 }
  0xcb   :  { %v83_v14 = vpop.xlane.xlu0 %82 }
  0xcc   :  { %101 = vst.msk [vmem:[#allocation3] sm:$0xff] %vm98_vm1, %v83_v14 }
  0xce   :  { %v110_v15 = vld [vmem:[#allocation4] sm:$0xff] }
  0xcf   :  { %v108_v16 = vld [vmem:[#allocation2] sm:$0xff]  ;;  %v127_v17 = vsel %vm98_vm1, %v110_v15, 0.0 }
  0xd0   :  { %v111_v18 = vsel %vm98_vm1, %v108_v16, 0.0  ;;  %v128_v19 = vrot.slane %v127_v17, 4 }
  0xd1   :  { %v112_v20 = vrot.slane %v111_v18, 4 }
  0xd2   :  { %v129_v21 = vadd.f32 %v128_v19, %v127_v17 }
  0xd3   :  { %v109_v22 = vld [vmem:[#allocation3] sm:$0xff]  ;;  %v113_v23 = vadd.f32 %v112_v20, %v111_v18 }
  0xd4   :  { %v119_v24 = vsel %vm98_vm1, %v109_v22, 0.0  ;;  %v130_v25 = vrot.slane %v129_v21, 2 }
  0xd5   :  { %v114_v26 = vrot.slane %v113_v23, 2  ;;  %v120_v27 = vrot.slane %v119_v24, 4 }
  0xd6   :  { %v131_v28 = vadd.f32 %v130_v25, %v129_v21 }
  0xd7   :  { %v115_v29 = vadd.f32 %v114_v26, %v113_v23  ;;  %v121_v30 = vadd.f32 %v120_v27, %v119_v24 }
  0xd8   :  { %v132_v31 = vrot.slane %v131_v28, 1 }
  0xd9   :  { %v116_v32 = vrot.slane %v115_v29, 1  ;;  %v122_v33 = vrot.slane %v121_v30, 2 }
  0xda   :  { %v133_v34 = vadd.f32 %v132_v31, %v131_v28 }
  0xdb   :  { %v117_v35 = vadd.f32 %v116_v32, %v115_v29  ;;  %v123_v36 = vadd.f32 %v122_v33, %v121_v30 }
  0xdc   :  { %v134_v37 = vmul.f32 0.125, %v133_v34 }
  0xdd   :  { %v118_v38 = vmul.f32 0.125, %v117_v35  ;;  %v124_v39 = vrot.slane %v123_v36, 1 }
  0xde   :  { %v137_v40 = vsub.f32 %v110_v15, %v134_v37 }
  0xdf   :  { %v125_v41 = vadd.f32 %v124_v39, %v123_v36  ;;  %v135_v42 = vsub.f32 %v108_v16, %v118_v38 }
  0xe0   :  { %v158_v43 = vmul.f32 %v137_v40, %v137_v40 }
  0xe1   :  { %v126_v44 = vmul.f32 0.125, %v125_v41  ;;  %v138_v45 = vmul.f32 %v135_v42, %v135_v42  ;;  %v177_v46 = vmul.f32 %v137_v40, %v135_v42 }
  0xe2   :  { %v159_v47 = vsel %vm98_vm1, %v158_v43, 0.0 }
  0xe3   :  { %v136_v48 = vsub.f32 %v109_v22, %v126_v44  ;;  %v139_v49 = vsel %vm98_vm1, %v138_v45, 0.0  ;;  %v160_v50 = vrot.slane %v159_v47, 4  ;;  %v178_v51 = vsel %vm98_vm1, %v177_v46, 0.0 }
  0xe4   :  { %v140_v52 = vrot.slane %v139_v49, 4  ;;  %v179_v58 = vrot.slane %v178_v51, 4 }
  0xe5   :  { %v148_v53 = vmul.f32 %v136_v48, %v136_v48  ;;  %v161_v54 = vadd.f32 %v160_v50, %v159_v47  ;;  %v168_v55 = vmul.f32 %v136_v48, %v135_v42  ;;  %v186_v56 = vmul.f32 %v137_v40, %v136_v48 }
  0xe6   :  { %v141_v57 = vadd.f32 %v140_v52, %v139_v49  ;;  %v180_v8 = vadd.f32 %v179_v58, %v178_v51 }
  0xe7   :  { %v149_v59 = vsel %vm98_vm1, %v148_v53, 0.0  ;;  %v162_v60 = vrot.slane %v161_v54, 2  ;;  %v169_v61 = vsel %vm98_vm1, %v168_v55, 0.0  ;;  %v187_v62 = vsel %vm98_vm1, %v186_v56, 0.0 }
  0xe8   :  { %v142_v63 = vrot.slane %v141_v57, 2  ;;  %v150_v0 = vrot.slane %v149_v59, 4  ;;  %v170_v1 = vrot.slane %v169_v61, 4  ;;  %v188_v3 = vrot.slane %v187_v62, 4 }
  0xe9   :  { %v163_v2 = vadd.f32 %v162_v60, %v161_v54  ;;  %v181_v17 = vrot.slane %v180_v8, 2 }
  0xea   :  { %v143_v4 = vadd.f32 %v142_v63, %v141_v57  ;;  %v151_v5 = vadd.f32 %v150_v0, %v149_v59  ;;  %v171_v7 = vadd.f32 %v170_v1, %v169_v61  ;;  %v189_v12 = vadd.f32 %v188_v3, %v187_v62 }
  0xeb   :  { %v164_v6 = vrot.slane %v163_v2, 1  ;;  %v182_v25 = vadd.f32 %v181_v17, %v180_v8 }
  0xec   :  { %v144_v9 = vrot.slane %v143_v4, 1  ;;  %v152_v10 = vrot.slane %v151_v5, 2  ;;  %v172_v16 = vrot.slane %v171_v7, 2  ;;  %v190_v21 = vrot.slane %v189_v12, 2 }
  0xed   :  { %v165_v11 = vadd.f32 %v164_v6, %v163_v2  ;;  %v183_v31 = vrot.slane %v182_v25, 1 }
  0xee   :  { %v145_v13 = vadd.f32 %v144_v9, %v143_v4  ;;  %v153_v14 = vadd.f32 %v152_v10, %v151_v5  ;;  %v173_v24 = vadd.f32 %v172_v16, %v171_v7  ;;  %v191_v28 = vadd.f32 %v190_v21, %v189_v12 }
  0xef   :  { %v166_v15 = vmul.f32 0.14285715, %v165_v11  ;;  %v184_v36 = vadd.f32 %v183_v31, %v182_v25 }
  0xf0   :  { %v146_v18 = vmul.f32 0.14285715, %v145_v13  ;;  %v154_v19 = vrot.slane %v153_v14, 1  ;;  %v174_v30 = vrot.slane %v173_v24, 1  ;;  %v192_v34 = vrot.slane %v191_v28, 1 }
  0xf1   :  { %v167_v20 = vadd.f32 1e-06, %v166_v15  ;;  %v185_v39 = vmul.f32 0.125, %v184_v36 }
  0xf2   :  { %v147_v22 = vadd.f32 1e-06, %v146_v18  ;;  %v155_v23 = vadd.f32 %v154_v19, %v153_v14  ;;  %v175_v35 = vadd.f32 %v174_v30, %v173_v24  ;;  %v193_v37 = vadd.f32 %v192_v34, %v191_v28 }
  0xf3   :  { %v199_v43 = vmul.f32 %v185_v39, %v185_v39 }
  0xf4   :  { %v156_v26 = vmul.f32 0.14285715, %v155_v23  ;;  %v200_v27 = vmul.f32 %v167_v20, %v147_v22  ;;  %v176_v38 = vmul.f32 0.125, %v175_v35  ;;  %v194_v40 = vmul.f32 0.125, %v193_v37 }
  0xf6   :  { %v157_v29 = vadd.f32 1e-06, %v156_v26  ;;  %235 = vrcp.f32 %v200_v27  ;;  %v195_v42 = vmul.f32 %v176_v38, %v176_v38  ;;  %v204_v48 = vmul.f32 %v194_v40, %v194_v40 }
  0xf8   :  { %v196_v32 = vmul.f32 %v157_v29, %v147_v22  ;;  %v205_v33 = vmul.f32 %v167_v20, %v157_v29 }
  0xfa   :  { %237 = vrcp.f32 %v196_v32 }
  0xfb   :  { %239 = vrcp.f32 %v205_v33 }
 0x100   :  { %v236_v41 = vpop.eup %235 }
 0x101   :  { %v202_v47 = vmul.f32 %v236_v41, %v199_v43 }
 0x104   :  { %v238_v44 = vpop.eup %237 }
 0x105   :  { %v240_v45 = vpop.eup %239  ;;  %v198_v46 = vmul.f32 %v238_v44, %v195_v42 }
 0x106   :  { %v207_v50 = vmul.f32 %v240_v45, %v204_v48 }
 0x107   :  { %v203_v49 = vadd.f32 %v202_v47, %v198_v46 }
 0x109   :  { %v208_v51 = vadd.f32 %v207_v50, %v203_v49 }
 0x10b   :  { %v209_v52 = vmul.f32 0.33333334, %v208_v51 }
 0x10d   :  { %211 = vst.msk [vmem:[#allocation11] sm:$0x1] %vm210_vm2, %v209_v52 }
 0x10e   :  { %318 = shalt.err (!%p315_p0)
}
 0x10f   :  { %s319_s15 = scalar_lea.hbm %s449_s6, 16 }
 0x110   :  { %p320_p1 = scmp.ne.s32.totalorder %s449_s6, %s319_s15  ;;  %p323_p2 = scmp.lt.u32.totalorder %s319_s15, %s449_s6 }
 0x112   :  { %p325_p3 = pnand %p323_p2, %p320_p1 }
 0x114   :  { %328 = shalt.err (!%p325_p3)
}
 0x115   :  { %221 = dma.vmem_to_hbm [thread:$0]  %s219_s3, 16, %s449_s6, [#allocation7]  }
 0x116   :  { %333 = dma.done.wait [#allocation7], 16  }
 0x117   :  { %334 = vsyncadd [#allocation7], 4294967280 }
 0x118   :  { %225 = vsyncpa [#allocation6], 1 }
 0x119   :  { %226 = vsyncpa [#allocation9], 1 }
 0x11a   :  { %227 = vsyncpa [#allocation7], 1 }

</bundles_post_ra>
